<compile_context>
chip_gen: v7x
topology: tpu7x:2x2x1
jax: 0.10.0
libtpu: 0.0.40
codegen_flags: <defaults>
</compile_context>

<pallas_src>
import functools

import jax
import jax.numpy as jnp
from jax.experimental import pallas as pl
from jax.experimental.pallas import tpu as pltpu


BN_EPS = 1e-5
SOFTPLUS_THRESHOLD = 20.0   # PyTorch nn.Softplus default (beta=1)
NEG_BIG = -1e30             # logit fill for padded softmax columns -> exp() == 0
LANE = 128
SUBLANE = 8

# VMEM budgets (bytes).  Kept below v5e's 16 MiB default scoped-VMEM limit so no
# vmem_limit_bytes override is needed on any generation (v5e 16, v6e/v7x 32 MiB
# default scoped; v7x 64 MiB physical).
_PIPELINE_VMEM_BUDGET = 12 * 1024 * 1024
_FAST_PATH_VMEM_BUDGET = 10 * 1024 * 1024   # counts 2x for default double-buffering


def _round_up(a, b):
    return ((a + b - 1) // b) * b


# ---------------------------------------------------------------------------
# Shared: activations + direct (lane-aligned) stores of the three heads.
# ---------------------------------------------------------------------------
def _activate_and_store(z, out_ref, Gp, GOp):
    # pi head: softmax over the first Gp lanes (padded columns hold NEG_BIG logits,
    # so exp() underflows to 0 and they contribute nothing to the denominator).
    logits = z[:, :Gp]
    lmax = jnp.max(logits, axis=1, keepdims=True)
    e = jnp.exp(logits - lmax)
    denom = jnp.sum(e, axis=1, keepdims=True)
    r = pl.reciprocal(denom, approx=True)                 # EUP vrcp (free slot)
    r = r * (jnp.float32(2.0) - denom * r)                # 1 Newton step -> ~f32 exact
    out_ref[:, :Gp] = e * r

    # sigma head: Softplus (beta=1, threshold=20).  log1p form: no exp overflow and
    # no underflow-to-zero for very negative inputs.
    sz = z[:, Gp:Gp + GOp]
    sp = jnp.log1p(jnp.exp(jnp.minimum(sz, jnp.float32(SOFTPLUS_THRESHOLD))))
    out_ref[:, Gp:Gp + GOp] = jnp.where(sz > jnp.float32(SOFTPLUS_THRESHOLD), sz, sp)

    # mu head: Sigmoid.
    mz = z[:, Gp + GOp:]
    out_ref[:, Gp + GOp:] = jnp.float32(1.0) / (jnp.float32(1.0) + jnp.exp(-mz))


# ---------------------------------------------------------------------------
# Fast path: whole problem resident in VMEM -> one kernel, x read once.
# ---------------------------------------------------------------------------
def _mdn_fused_kernel(x_ref, gamma_ref, beta_ref, w_ref, b_ref, out_ref, *,
                      batch, Gp, GOp):
    x = x_ref[...]                                        # (Bp, F), zero-padded rows
    inv_b = jnp.float32(1.0 / batch)
    mean = jnp.sum(x, axis=0, keepdims=True) * inv_b
    ex2 = jnp.sum(x * x, axis=0, keepdims=True) * inv_b
    var = jnp.maximum(ex2 - mean * mean, jnp.float32(0.0))   # clamp: no negative var
    rstd = jax.lax.rsqrt(var + jnp.float32(BN_EPS))

    scale = rstd * gamma_ref[...]                         # (1, F)
    shift = beta_ref[...] - mean * scale                  # (1, F)
    xn = x * scale + shift                                # (Bp, F)

    z = jnp.dot(xn, w_ref[...], preferred_element_type=jnp.float32) + b_ref[...]
    _activate_and_store(z, out_ref, Gp, GOp)


# ---------------------------------------------------------------------------
# Two-pass path, phase 1: per-feature (sum, sum-of-squares) across batch tiles.
# Padding rows are zero (jnp.pad) so no row masking is needed.
# ---------------------------------------------------------------------------
def _bn_stats_kernel(x_ref, stats_ref):
    x = x_ref[...]                                        # (TB, F)
    s = jnp.sum(x, axis=0, keepdims=True)
    sq = jnp.sum(x * x, axis=0, keepdims=True)

    @pl.when(pl.program_id(0) == 0)
    def _():
        stats_ref[...] = jnp.zeros_like(stats_ref)

    stats_ref[...] += jnp.concatenate([s, sq], axis=0)    # (2, F) resident accumulator


# ---------------------------------------------------------------------------
# Two-pass path, phase 2: bare matmul + activations (BN folded into W'/b').
# ---------------------------------------------------------------------------
def _mdn_heads_kernel(x_ref, w_ref, b_ref, out_ref, *, Gp, GOp):
    z = jnp.dot(x_ref[...], w_ref[...], preferred_element_type=jnp.float32) + b_ref[...]
    _activate_and_store(z, out_ref, Gp, GOp)


# ---------------------------------------------------------------------------
# Wrapper
# ---------------------------------------------------------------------------
@functools.partial(jax.jit,
                   static_argnames=("num_gaussians", "out_features", "block_rows"))
def mdn_forward(x, params, *, num_gaussians, out_features, block_rows=None):
    """x: (B, F) float32.  Returns (pi (B,G), sigma (B,G,O), mu (B,G,O))."""
    B, F = x.shape
    G = num_gaussians
    GO = num_gaussians * out_features

    # 128-lane-aligned fused head layout: [pi | sigma | mu].
    Gp = _round_up(G, LANE)
    GOp = _round_up(GO, LANE)
    Np = Gp + 2 * GOp

    def pad_cols(a, n, fill=0.0):
        if a.shape[1] == n:
            return a
        return jnp.pad(a, ((0, 0), (0, n - a.shape[1])), constant_values=fill)

    # Fused + padded weights / biases.  Padded pi bias columns get NEG_BIG so their
    # softmax contribution is exactly zero; padded weight columns are zero.
    w_heads = jnp.concatenate([pad_cols(params["w_pi"], Gp),
                               pad_cols(params["w_sigma"], GOp),
                               pad_cols(params["w_mu"], GOp)], axis=1)     # (F, Np)
    b_heads = jnp.concatenate([pad_cols(params["b_pi"], Gp, NEG_BIG),
                               pad_cols(params["b_sigma"], GOp),
                               pad_cols(params["b_mu"], GOp)], axis=1)     # (1, Np)

    itemsize = 4  # float32
    B8 = _round_up(B, SUBLANE)
    fast_bytes = 2 * itemsize * (B8 * F + B8 * Np + F * Np + 2 * F + Np)

    if block_rows is None and fast_bytes <= _FAST_PATH_VMEM_BUDGET:
        # ---------------- fast path: single kernel, x read from HBM once ----------
        xp = x if B8 == B else jnp.pad(x, ((0, B8 - B), (0, 0)))
        out = pl.pallas_call(
            functools.partial(_mdn_fused_kernel, batch=B, Gp=Gp, GOp=GOp),
            out_shape=jax.ShapeDtypeStruct((B8, Np), jnp.float32),
            grid=(1,),
            in_specs=[
                pl.BlockSpec((B8, F), lambda i: (0, 0)),
                pl.BlockSpec((1, F), lambda i: (0, 0)),
                pl.BlockSpec((1, F), lambda i: (0, 0)),
                pl.BlockSpec((F, Np), lambda i: (0, 0)),
                pl.BlockSpec((1, Np), lambda i: (0, 0)),
            ],
            out_specs=pl.BlockSpec((B8, Np), lambda i: (0, 0)),
            compiler_params=pltpu.CompilerParams(
                dimension_semantics=("arbitrary",)),
        )(xp, params["gamma"], params["beta"], w_heads, b_heads)
        Bslice = B
    else:
        # ---------------- two-pass path (large batch) -----------------------------
        # Derive TB from the VMEM budget: 2x x-tile + 2x out-tile + 2x weight/bias.
        if block_rows is None:
            avail = _PIPELINE_VMEM_BUDGET - 2 * itemsize * (F * Np + Np)
            block_rows = int(max(avail // (2 * itemsize * (F + Np)), SUBLANE))
        TB = max(SUBLANE,
                 (min(block_rows, _round_up(B, SUBLANE)) // SUBLANE) * SUBLANE)
        Bp = _round_up(B, TB)
        nb = Bp // TB
        xp = x if Bp == B else jnp.pad(x, ((0, Bp - B), (0, 0)))

        # Phase 1: per-feature sums (resident (2,F) accumulator, sequential axis).
        sums = pl.pallas_call(
            _bn_stats_kernel,
            out_shape=jax.ShapeDtypeStruct((2, F), jnp.float32),
            grid=(nb,),
            in_specs=[pl.BlockSpec((TB, F), lambda i: (i, 0))],
            out_specs=pl.BlockSpec((2, F), lambda i: (0, 0)),
            compiler_params=pltpu.CompilerParams(
                dimension_semantics=("arbitrary",)),
        )(xp)

        # Fold BatchNorm affine into the fused head weight/bias (tiny XLA ops):
        #   ((x - mean) * rstd * gamma + beta) @ W + b
        #     == x @ (W * scale_col) + (b + shift @ W)
        mean = sums[0:1, :] / jnp.float32(B)
        var = jnp.maximum(sums[1:2, :] / jnp.float32(B) - mean * mean, 0.0)
        rstd = jax.lax.rsqrt(var + jnp.float32(BN_EPS))
        scale = rstd * params["gamma"]                     # (1, F)
        shift = params["beta"] - mean * scale              # (1, F)
        w_fold = w_heads * scale.T                         # (F, Np)
        b_fold = b_heads + shift @ w_heads                 # (1, Np)

        # Phase 2: pure matmul + activations; batch axis "parallel" (2 TCs on v7x).
        out = pl.pallas_call(
            functools.partial(_mdn_heads_kernel, Gp=Gp, GOp=GOp),
            out_shape=jax.ShapeDtypeStruct((Bp, Np), jnp.float32),
            grid=(nb,),
            in_specs=[
                pl.BlockSpec((TB, F), lambda i: (i, 0)),   # x tile (pipelined)
                pl.BlockSpec((F, Np), lambda i: (0, 0)),   # folded weight (resident)
                pl.BlockSpec((1, Np), lambda i: (0, 0)),   # folded bias   (resident)
            ],
            out_specs=pl.BlockSpec((TB, Np), lambda i: (i, 0)),
            compiler_params=pltpu.CompilerParams(
                dimension_semantics=("parallel",)),
        )(xp, w_fold, b_fold)
        Bslice = B

    out = out[:Bslice]
    pi = out[:, :G]
    sigma = out[:, Gp:Gp + GO].reshape(B, G, out_features)
    mu = out[:, Gp + GOp:Gp + GOp + GO].reshape(B, G, out_features)
    return pi, sigma, mu


def init_params(key, in_features, out_features, num_gaussians):
    """PyTorch-style init; weights stored as (in, out) so kernel does x @ W + b."""
    G, O, F = num_gaussians, out_features, in_features
    ks = jax.random.split(key, 3)

    def lin(k, fan_in, fan_out):
        bound = 1.0 / jnp.sqrt(jnp.float32(fan_in))
        kw, kb = jax.random.split(k)
        w = jax.random.uniform(kw, (fan_in, fan_out), jnp.float32, -bound, bound)
        b = jax.random.uniform(kb, (1, fan_out), jnp.float32, -bound, bound)
        return w, b

    w_pi, b_pi = lin(ks[0], F, G)
    w_sigma, b_sigma = lin(ks[1], F, O * G)
    w_mu, b_mu = lin(ks[2], F, O * G)

    return {
        "gamma": jnp.ones((1, F), jnp.float32),     # BatchNorm1d default affine init
        "beta": jnp.zeros((1, F), jnp.float32),
        "w_pi": w_pi, "b_pi": b_pi,
        "w_sigma": w_sigma, "b_sigma": b_sigma,
        "w_mu": w_mu, "b_mu": b_mu,
    }


def _reference(x, params, G, O):
    mean = jnp.mean(x, axis=0, keepdims=True)
    var = jnp.mean((x - mean) ** 2, axis=0, keepdims=True)
    xn = (x - mean) / jnp.sqrt(var + BN_EPS) * params["gamma"] + params["beta"]
    pi = jax.nn.softmax(xn @ params["w_pi"] + params["b_pi"], axis=1)
    sigma = jax.nn.softplus(xn @ params["w_sigma"] + params["b_sigma"]).reshape(-1, G, O)
    mu = jax.nn.sigmoid(xn @ params["w_mu"] + params["b_mu"]).reshape(-1, G, O)
    return pi, sigma, mu


def _check(pi, sigma, mu, x, params, B, G, O):
    assert pi.shape == (B, G)
    assert sigma.shape == (B, G, O)
    assert mu.shape == (B, G, O)
    assert bool(jnp.all(jnp.isfinite(pi)))
    assert bool(jnp.all(jnp.isfinite(sigma)))
    assert bool(jnp.all(jnp.isfinite(mu)))
    assert bool(jnp.allclose(jnp.sum(pi, axis=1), 1.0, atol=1e-5))   # softmax rows sum to 1
    assert bool(jnp.all(sigma > 0.0))                                # softplus output
    assert bool(jnp.all((mu > 0.0) & (mu < 1.0)))                    # sigmoid output
    ref = _reference(x, params, G, O)
    for got, want in zip((pi, sigma, mu), ref):
        assert float(jnp.max(jnp.abs(got - want))) < 5e-2            # MXU f32 precision


if __name__ == "__main__":
    key = jax.random.PRNGKey(0)
    k_x1, k_p1, k_x2, k_p2 = jax.random.split(key, 4)

    # --- Test 1: small batch -> single-kernel fast path --------------------------
    B1, F1, O1, G1 = 20, 64, 1, 4
    x1 = jax.random.normal(k_x1, (B1, F1), jnp.float32)
    p1 = init_params(k_p1, F1, O1, G1)
    pi1, sg1, mu1 = mdn_forward(x1, p1, num_gaussians=G1, out_features=O1)
    jax.block_until_ready((pi1, sg1, mu1))
    _check(pi1, sg1, mu1, x1, p1, B1, G1, O1)

    # --- Test 2: larger batch, explicit tiling -> two-pass pipelined path --------
    B2, F2, O2, G2 = 1024, 128, 2, 4
    x2 = jax.random.normal(k_x2, (B2, F2), jnp.float32)
    p2 = init_params(k_p2, F2, O2, G2)
    pi2, sg2, mu2 = mdn_forward(x2, p2, num_gaussians=G2, out_features=O2,
                                block_rows=512)
    jax.block_until_ready((pi2, sg2, mu2))
    _check(pi2, sg2, mu2, x2, p2, B2, G2, O2)

    print("KERNEL_OK")
</pallas_src>

<mosaic_0001>
module attributes {stable_mosaic.version = 11 : i64} {
  func.func @_mdn_fused_kernel(%arg0: i32, %arg1: memref<24x64xf32, #tpu.memory_space<vmem>>, %arg2: memref<1x64xf32, #tpu.memory_space<vmem>>, %arg3: memref<1x64xf32, #tpu.memory_space<vmem>>, %arg4: memref<64x384xf32, #tpu.memory_space<vmem>>, %arg5: memref<1x384xf32, #tpu.memory_space<vmem>>, %arg6: memref<24x384xf32, #tpu.memory_space<vmem>>) attributes {dimension_semantics = [#tpu.dimension_semantics<arbitrary>], iteration_bounds = array<i64: 1>, scalar_prefetch = 0 : i64, scratch_operands = 0 : i64, tpu.core_type = #tpu.core_type<tc>, window_params = [{pipeline_mode = #tpu.pipeline_mode<synchronous>, transform_indices = @transform_0, window_bounds = array<i64: 24, 64>}, {pipeline_mode = #tpu.pipeline_mode<synchronous>, transform_indices = @transform_1, window_bounds = array<i64: 1, 64>}, {pipeline_mode = #tpu.pipeline_mode<synchronous>, transform_indices = @transform_2, window_bounds = array<i64: 1, 64>}, {pipeline_mode = #tpu.pipeline_mode<synchronous>, transform_indices = @transform_3, window_bounds = array<i64: 64, 384>}, {pipeline_mode = #tpu.pipeline_mode<synchronous>, transform_indices = @transform_4, window_bounds = array<i64: 1, 384>}, {pipeline_mode = #tpu.pipeline_mode<synchronous>, transform_indices = @transform_5, window_bounds = array<i64: 24, 384>}]} {
    %c0 = arith.constant 0 : index
    %c0_0 = arith.constant 0 : index
    %0 = vector.load %arg1[%c0, %c0_0] : memref<24x64xf32, #tpu.memory_space<vmem>>, vector<24x64xf32>
    %cst = arith.constant dense<0.000000e+00> : vector<64xf32>
    %1 = vector.multi_reduction <add>, %0, %cst [0] : vector<24x64xf32> to vector<64xf32>
    %2 = vector.shape_cast %1 : vector<64xf32> to vector<1x64xf32>
    %cst_1 = arith.constant 5.000000e-02 : f32
    %3 = vector.broadcast %cst_1 : f32 to vector<1x64xf32>
    %4 = arith.mulf %2, %3 : vector<1x64xf32>
    %5 = arith.mulf %0, %0 : vector<24x64xf32>
    %cst_2 = arith.constant dense<0.000000e+00> : vector<64xf32>
    %6 = vector.multi_reduction <add>, %5, %cst_2 [0] : vector<24x64xf32> to vector<64xf32>
    %7 = vector.shape_cast %6 : vector<64xf32> to vector<1x64xf32>
    %cst_3 = arith.constant 5.000000e-02 : f32
    %8 = vector.broadcast %cst_3 : f32 to vector<1x64xf32>
    %9 = arith.mulf %7, %8 : vector<1x64xf32>
    %10 = arith.mulf %4, %4 : vector<1x64xf32>
    %11 = arith.subf %9, %10 : vector<1x64xf32>
    %cst_4 = arith.constant 0.000000e+00 : f32
    %12 = vector.broadcast %cst_4 : f32 to vector<1x64xf32>
    %13 = arith.maximumf %11, %12 : vector<1x64xf32>
    %cst_5 = arith.constant 9.99999974E-6 : f32
    %14 = vector.broadcast %cst_5 : f32 to vector<1x64xf32>
    %15 = arith.addf %13, %14 : vector<1x64xf32>
    %16 = math.rsqrt %15 : vector<1x64xf32>
    %c0_6 = arith.constant 0 : index
    %c0_7 = arith.constant 0 : index
    %17 = vector.load %arg2[%c0_6, %c0_7] : memref<1x64xf32, #tpu.memory_space<vmem>>, vector<1x64xf32>
    %18 = arith.mulf %16, %17 : vector<1x64xf32>
    %c0_8 = arith.constant 0 : index
    %c0_9 = arith.constant 0 : index
    %19 = vector.load %arg3[%c0_8, %c0_9] : memref<1x64xf32, #tpu.memory_space<vmem>>, vector<1x64xf32>
    %20 = arith.mulf %4, %18 : vector<1x64xf32>
    %21 = arith.subf %19, %20 : vector<1x64xf32>
    %22 = vector.broadcast %18 : vector<1x64xf32> to vector<24x64xf32>
    %23 = arith.mulf %0, %22 : vector<24x64xf32>
    %24 = vector.broadcast %21 : vector<1x64xf32> to vector<24x64xf32>
    %25 = arith.addf %23, %24 : vector<24x64xf32>
    %c0_10 = arith.constant 0 : index
    %c0_11 = arith.constant 0 : index
    %26 = vector.load %arg4[%c0_10, %c0_11] : memref<64x384xf32, #tpu.memory_space<vmem>>, vector<64x384xf32>
    %cst_12 = arith.constant dense<0.000000e+00> : vector<24x384xf32>
    %27 = tpu.matmul %25, %26, %cst_12 {dimension_numbers = #tpu.dot_dimension_numbers<[1], [0], [0], [1], [0, 0, 1, 1], [], []>} : vector<24x64xf32>, vector<64x384xf32>, vector<24x384xf32> -> vector<24x384xf32>
    %c0_13 = arith.constant 0 : index
    %c0_14 = arith.constant 0 : index
    %28 = vector.load %arg5[%c0_13, %c0_14] : memref<1x384xf32, #tpu.memory_space<vmem>>, vector<1x384xf32>
    %29 = vector.broadcast %28 : vector<1x384xf32> to vector<24x384xf32>
    %30 = arith.addf %27, %29 : vector<24x384xf32>
    %31 = vector.extract_strided_slice %30 {offsets = [0, 0], sizes = [24, 128], strides = [1, 1]} : vector<24x384xf32> to vector<24x128xf32>
    %cst_15 = arith.constant dense<0xFF800000> : vector<24xf32>
    %32 = vector.multi_reduction <maximumf>, %31, %cst_15 [1] : vector<24x128xf32> to vector<24xf32>
    %33 = vector.shape_cast %32 : vector<24xf32> to vector<24x1xf32>
    %34 = vector.broadcast %33 : vector<24x1xf32> to vector<24x128xf32>
    %35 = arith.subf %31, %34 : vector<24x128xf32>
    %36 = math.exp %35 : vector<24x128xf32>
    %cst_16 = arith.constant dense<0.000000e+00> : vector<24xf32>
    %37 = vector.multi_reduction <add>, %36, %cst_16 [1] : vector<24x128xf32> to vector<24xf32>
    %38 = vector.shape_cast %37 : vector<24xf32> to vector<24x1xf32>
    %39 = tpu.reciprocal %38 {approx = true} : vector<24x1xf32> -> vector<24x1xf32>
    %40 = arith.mulf %38, %39 : vector<24x1xf32>
    %cst_17 = arith.constant 2.000000e+00 : f32
    %41 = vector.broadcast %cst_17 : f32 to vector<24x1xf32>
    %42 = arith.subf %41, %40 : vector<24x1xf32>
    %43 = arith.mulf %39, %42 : vector<24x1xf32>
    %44 = vector.broadcast %43 : vector<24x1xf32> to vector<24x128xf32>
    %45 = arith.mulf %36, %44 : vector<24x128xf32>
    %c0_18 = arith.constant 0 : index
    %c0_19 = arith.constant 0 : index
    %46 = vector.load %arg6[%c0_18, %c0_19] : memref<24x384xf32, #tpu.memory_space<vmem>>, vector<24x128xf32>
    tpu.vector_store %arg6[%c0_18, %c0_19], %45 {strides = array<i32>} : memref<24x384xf32, #tpu.memory_space<vmem>>, vector<24x128xf32>,
    %47 = vector.extract_strided_slice %30 {offsets = [0, 128], sizes = [24, 128], strides = [1, 1]} : vector<24x384xf32> to vector<24x128xf32>
    %cst_20 = arith.constant 2.000000e+01 : f32
    %48 = vector.broadcast %cst_20 : f32 to vector<24x128xf32>
    %49 = arith.minimumf %47, %48 : vector<24x128xf32>
    %50 = math.exp %49 : vector<24x128xf32>
    %51 = math.log1p %50 : vector<24x128xf32>
    %cst_21 = arith.constant 2.000000e+01 : f32
    %52 = vector.broadcast %cst_21 : f32 to vector<24x128xf32>
    %53 = arith.cmpf ogt, %47, %52 : vector<24x128xf32>
    %54 = arith.select %53, %47, %51 : vector<24x128xi1>, vector<24x128xf32>
    %c0_22 = arith.constant 0 : index
    %c128 = arith.constant 128 : index
    %55 = vector.load %arg6[%c0_22, %c128] : memref<24x384xf32, #tpu.memory_space<vmem>>, vector<24x128xf32>
    tpu.vector_store %arg6[%c0_22, %c128], %54 {strides = array<i32>} : memref<24x384xf32, #tpu.memory_space<vmem>>, vector<24x128xf32>,
    %56 = vector.extract_strided_slice %30 {offsets = [0, 256], sizes = [24, 128], strides = [1, 1]} : vector<24x384xf32> to vector<24x128xf32>
    %cst_23 = arith.constant 0.000000e+00 : f32
    %57 = vector.broadcast %cst_23 : f32 to vector<24x128xf32>
    %58 = arith.subf %57, %56 : vector<24x128xf32>
    %59 = math.exp %58 : vector<24x128xf32>
    %cst_24 = arith.constant 1.000000e+00 : f32
    %60 = vector.broadcast %cst_24 : f32 to vector<24x128xf32>
    %61 = arith.addf %60, %59 : vector<24x128xf32>
    %cst_25 = arith.constant 1.000000e+00 : f32
    %62 = vector.broadcast %cst_25 : f32 to vector<24x128xf32>
    %63 = arith.divf %62, %61 : vector<24x128xf32>
    %c0_26 = arith.constant 0 : index
    %c256 = arith.constant 256 : index
    %64 = vector.load %arg6[%c0_26, %c256] : memref<24x384xf32, #tpu.memory_space<vmem>>, vector<24x128xf32>
    tpu.vector_store %arg6[%c0_26, %c256], %63 {strides = array<i32>} : memref<24x384xf32, #tpu.memory_space<vmem>>, vector<24x128xf32>,
    return
  }
  func.func @transform_0(%arg0: i32) -> (i32, i32) {
    %c0_i32 = arith.constant 0 : i32
    %c0_i32_0 = arith.constant 0 : i32
    %c0_i32_1 = arith.constant 0 : i32
    return %c0_i32, %c0_i32_0 : i32, i32
  }
  func.func @transform_1(%arg0: i32) -> (i32, i32) {
    %c0_i32 = arith.constant 0 : i32
    %c0_i32_0 = arith.constant 0 : i32
    %c0_i32_1 = arith.constant 0 : i32
    return %c0_i32, %c0_i32_0 : i32, i32
  }
  func.func @transform_2(%arg0: i32) -> (i32, i32) {
    %c0_i32 = arith.constant 0 : i32
    %c0_i32_0 = arith.constant 0 : i32
    %c0_i32_1 = arith.constant 0 : i32
    return %c0_i32, %c0_i32_0 : i32, i32
  }
  func.func @transform_3(%arg0: i32) -> (i32, i32) {
    %c0_i32 = arith.constant 0 : i32
    %c0_i32_0 = arith.constant 0 : i32
    %c0_i32_1 = arith.constant 0 : i32
    return %c0_i32, %c0_i32_0 : i32, i32
  }
  func.func @transform_4(%arg0: i32) -> (i32, i32) {
    %c0_i32 = arith.constant 0 : i32
    %c0_i32_0 = arith.constant 0 : i32
    %c0_i32_1 = arith.constant 0 : i32
    return %c0_i32, %c0_i32_0 : i32, i32
  }
  func.func @transform_5(%arg0: i32) -> (i32, i32) {
    %c0_i32 = arith.constant 0 : i32
    %c0_i32_0 = arith.constant 0 : i32
    %c0_i32_1 = arith.constant 0 : i32
    return %c0_i32, %c0_i32_0 : i32, i32
  }
}

</mosaic_0001>

<bundles_post_ra>
// kernel: mdn_forward.1
= control target key start
LH: loop header
LB: loop body
LE: loop exit
PB: predicated region body
PF: predicated region fallthrough
CT: control target
= control target key end

     0   :  { %v510_v3 = vmov 0.0   ;;  %vm23_vm0 = vcmask 523264   ;;  %v61_v59 = vlaneseq  ;;  %vm512_vm1 = vmmov 0   ;;  %s703_s3 = inlined_call_operand.vmem [shape: f32[64,384], index: 3, kind: input, shape index: {}]   ;;  %s704_s0 = inlined_call_operand.vmem [shape: f32[24,64], index: 0, kind: input, shape index: {}]   ;;  %s705_s1 = inlined_call_operand.vmem [shape: f32[1,64], index: 1, kind: input, shape index: {}]   ;;  %s706_s2 = inlined_call_operand.vmem [shape: f32[1,64], index: 2, kind: input, shape index: {}]   ;;  %s707_s4 = inlined_call_operand.vmem [shape: f32[1,384], index: 4, kind: input, shape index: {}]   ;;  %s708_s5 = inlined_call_operand.vmem [shape: f32[24,384], index: 5, kind: output, shape index: {}]  }
   0x1   :  { %v78_v0 = vld [vmem:[%s703_s3 + $0x8] sm:$0xff]  ;;  %v81_v1 = vld [vmem:[%s703_s3 + $0x20] sm:$0xff]  ;;  %191 = vmatprep.mubr.f32.mxu0 %v510_v3  ;;  %v80_v5 = vld [vmem:[%s703_s3 + $0x18] sm:$0xff]  ;;  %432 = vmatprep.mubr.msk.f32.mxu1 %vm512_vm1, %v510_v3 }
   0x2   :  { %v77_v2 = vld [vmem:[%s703_s3] sm:$0xff]  ;;  %v441_v4 = vpack.c.bf16 %v81_v1, %v78_v0  ;;  %v84_v6 = vld [vmem:[%s703_s3 + $0x38] sm:$0xff]  ;;  %v87_v7 = vld [vmem:[%s703_s3 + $0x50] sm:$0xff]  ;;  %v607_v60 = vshrl.u32 %v61_v59, 7 }
   0x3   :  { %v443_v8 = vpack.c.bf16 %v80_v5, %v77_v2  ;;  %v445_v9 = vpack.c.bf16 %v87_v7, %v84_v6  ;;  %v83_v10 = vld [vmem:[%s703_s3 + $0x30] sm:$0xff]  ;;  %v86_v11 = vld [vmem:[%s703_s3 + $0x48] sm:$0xff]  ;;  %v93_v13 = vld [vmem:[%s703_s3 + $0x80] sm:$0xff] }
   0x4   :  { %v90_v12 = vld [vmem:[%s703_s3 + $0x68] sm:$0xff]  ;;  %442 = vmatprep.subr.bf16.mxu0 %v441_v4  ;;  %v447_v14 = vpack.c.bf16 %v86_v11, %v83_v10  ;;  %v89_v15 = vld [vmem:[%s703_s3 + $0x60] sm:$0xff]  ;;  %v92_v17 = vld [vmem:[%s703_s3 + $0x78] sm:$0xff]  ;;  %v63_v62 = vsub.s32 0, %v607_v60 }
   0x5   :  { %444 = vmatpush1.bf16.msra.mxu0 %v443_v8  ;;  %v449_v16 = vpack.c.bf16 %v93_v13, %v90_v12  ;;  %v20_v18 = vld [vmem:[%s704_s0] sm:$0xff]  ;;  %v21_v19 = vld [vmem:[%s704_s0 + $0x8] sm:$0xff]  ;;  %v96_v20 = vld [vmem:[%s703_s3 + $0x98] sm:$0xff]  ;;  %v451_v30 = vpack.c.bf16 %v92_v17, %v89_v15 }
   0x6   :  { %446 = vmatprep.subr.bf16.mxu0 %v445_v9  ;;  %v99_v21 = vld [vmem:[%s703_s3 + $0xb0] sm:$0xff]  ;;  %v24_v23 = vsel %vm23_vm0, %v20_v18, 0.0  ;;  %v25_v24 = vsel %vm23_vm0, %v21_v19, 0.0  ;;  %v36_v25 = vmul.f32 %v20_v18, %v20_v18  ;;  %v37_v28 = vmul.f32 %v21_v19, %v21_v19  ;;  %v98_v34 = vld [vmem:[%s703_s3 + $0xa8] sm:$0xff]  ;;  %v56_v61 = vld [vmem:[%s705_s1] sm:$0x1] }
   0x7   :  { %v22_v22 = vld [vmem:[%s704_s0 + $0x10] sm:$0xff]  ;;  %v26_v26 = vadd.f32 %v25_v24, %v24_v23  ;;  %v453_v32 = vpack.c.bf16 %v99_v21, %v96_v20  ;;  %v58_v1 = vld [vmem:[%s706_s2] sm:$0x1]  ;;  %v94_v21 = vld [vmem:[%s703_s3 + $0x88] sm:$0xff] }
   0x8   :  { %v27_v27 = vsel %vm23_vm0, %v22_v22, 0.0  ;;  %v38_v29 = vmul.f32 %v22_v22, %v22_v22  ;;  %v39_v31 = vsel %vm23_vm0, %v36_v25, 0.0  ;;  %v95_v33 = vld [vmem:[%s703_s3 + $0x90] sm:$0xff]  ;;  %v40_v36 = vsel %vm23_vm0, %v37_v28, 0.0  ;;  %v85_v15 = vld [vmem:[%s703_s3 + $0x40] sm:$0xff]  ;;  %v100_v24 = vld [vmem:[%s703_s3 + $0xb8] sm:$0xff] }
   0x9   :  { %448 = vmatpush1.bf16.msra.mxu0 %v447_v14  ;;  %v28_v35 = vadd.f32 %v27_v27, %v26_v26  ;;  %v41_v38 = vadd.f32 %v40_v36, %v39_v31  ;;  %v455_v40 = vpack.c.bf16 %v98_v34, %v95_v33  ;;  %v79_v13 = vld [vmem:[%s703_s3 + $0x10] sm:$0xff]  ;;  %v82_v14 = vld [vmem:[%s703_s3 + $0x28] sm:$0xff]  ;;  %v97_v23 = vld [vmem:[%s703_s3 + $0xa0] sm:$0xff]  ;;  %v109_v27 = vsub.s32 1, %v607_v60 }
   0xa   :  { %450 = vmatprep.subr.bf16.mxu0 %v449_v16  ;;  %v42_v37 = vsel %vm23_vm0, %v38_v29, 0.0  ;;  %v511_v16 = vmov 0.0|0.0   ;;  %v458_v17 = vpack.c.bf16 %v82_v14, %v79_v13  ;;  %v91_v20 = vld [vmem:[%s703_s3 + $0x70] sm:$0xff]  ;;  %v467_v25 = vpack.c.bf16 %v100_v24, %v97_v23  ;;  %v657_v26 = vld [vmem:[%s707_s4] sm:$0x7] }
   0xb   :  { %v29_v39 = vrot.slane %v28_v35, 4  ;;  %v43_v41 = vadd.f32 %v42_v37, %v41_v38  ;;  %457 = vmatprep.subr.bf16.mxu1 %v511_v16  ;;  %v106_v28 = vrot.slane %v657_v26, %v63_v62  ;;  %v110_v29 = vrot.slane %v657_v26, %v109_v27 }
   0xc   :  { %459 = vmatpush3.bf16.msra.mxu1 %v458_v17 }
   0xd   :  { %452 = vmatpush1.bf16.msra.mxu0 %v451_v30  ;;  %v30_v42 = vadd.f32 %v29_v39, %v28_v35  ;;  %v44_v43 = vrot.slane %v43_v41, 4  ;;  %460 = vmatprep.subr.bf16.mxu1 %v511_v16 }
   0xe   :  { %454 = vmatprep.subr.bf16.mxu0 %v453_v32 }
   0xf   :  { %v31_v44 = vrot.slane %v30_v42, 2  ;;  %v45_v45 = vadd.f32 %v44_v43, %v43_v41 }
  0x11   :  { %456 = vmatpush1.bf16.msra.mxu0 %v455_v40  ;;  %v32_v46 = vadd.f32 %v31_v44, %v30_v42  ;;  %v46_v47 = vrot.slane %v45_v45, 2 }
  0x13   :  { %v33_v48 = vrot.slane %v32_v46, 1  ;;  %v47_v49 = vadd.f32 %v46_v47, %v45_v45 }
  0x15   :  { %v34_v50 = vadd.f32 %v33_v48, %v32_v46  ;;  %v48_v51 = vrot.slane %v47_v49, 1 }
  0x17   :  { %v35_v52 = vmul.f32 0.05, %v34_v50  ;;  %v49_v53 = vadd.f32 %v48_v51, %v47_v49 }
  0x19   :  { %v51_v54 = vmul.f32 %v35_v52, %v35_v52  ;;  %v50_v55 = vmul.f32 0.05, %v49_v53 }
  0x1b   :  { %v52_v56 = vsub.f32 %v50_v55, %v51_v54 }
  0x1d   :  { %v53_v57 = vmax.f32 %v52_v56, 0.0 }
  0x1f   :  { %v54_v58 = vadd.f32 1e-05, %v53_v57 }
  0x21   :  { %472 = vrsqrt.f32 %v54_v58 }
  0x2b   :  { %v473_v63 = vpop.eup %472 }
  0x2c   :  { %v57_v0 = vmul.f32 %v473_v63, %v56_v61 }
  0x2e   :  { %v59_v2 = vmul.f32 %v57_v0, %v35_v52  ;;  %v64_v4 = vrot.slane %v57_v0, %v63_v62 }
  0x30   :  { %v60_v5 = vsub.f32 %v58_v1, %v59_v2  ;;  %v65_v6 = vmul.f32 %v64_v4, %v20_v18  ;;  %v66_v8 = vmul.f32 %v64_v4, %v21_v19  ;;  %v67_v11 = vmul.f32 %v64_v4, %v22_v22  ;;  %v88_v18 = vld [vmem:[%s703_s3 + $0x58] sm:$0xff] }
  0x31   :  { %v461_v19 = vpack.c.bf16 %v88_v18, %v85_v15  ;;  %v464_v22 = vpack.c.bf16 %v94_v21, %v91_v20  ;;  %v113_v15 = vsub.s32 2, %v607_v60 }
  0x32   :  { %v72_v7 = vrot.slane %v60_v5, %v63_v62 }
  0x33   :  { %462 = vmatpush3.bf16.msra.mxu1 %v461_v19 }
  0x34   :  { %v74_v9 = vadd.f32 %v72_v7, %v65_v6  ;;  %v75_v10 = vadd.f32 %v72_v7, %v66_v8  ;;  %v76_v12 = vadd.f32 %v72_v7, %v67_v11  ;;  %463 = vmatprep.subr.bf16.mxu1 %v511_v16 }
  0x36   :  { %399 = vmatmul.mubr.msk.f32.vlgmr.msra.gmra.mrb[0].mxu0 %vm23_vm0, %v74_v9 }
  0x37   :  { %197 = vmatprep.mubr.f32.mxu0 %v510_v3  ;;  %465 = vmatpush3.bf16.msra.mxu1 %v464_v22 }
  0x38   :  { %466 = vmatprep.subr.bf16.mxu1 %v511_v16  ;;  %v114_v16 = vrot.slane %v657_v26, %v113_v15 }
  0x3a   :  { %400 = vmatmul.mubr.msk.f32.gmra.mrb[2].mxu0 %vm23_vm0, %v75_v10 }
  0x3b   :  { %203 = vmatprep.mubr.f32.mxu0 %v510_v3  ;;  %468 = vmatpush3.bf16.msra.mxu1 %v467_v25 }
  0x3e   :  { %401 = vmatmul.mubr.msk.f32.gmra.mrb[4].mxu0 %vm23_vm0, %v76_v12  ;;  %433 = vmatmul.mubr.msk.f32.vlgmr.msra.gmra.mrb[0].mxu1 %vm23_vm0, %v74_v9 }
  0x3f   :  { %435 = vmatprep.mubr.msk.f32.mxu1 %vm512_vm1, %v510_v3 }
  0x42   :  { %436 = vmatmul.mubr.msk.f32.gmra.mrb[2].mxu1 %vm23_vm0, %v75_v10 }
  0x43   :  { %438 = vmatprep.mubr.msk.f32.mxu1 %vm512_vm1, %v510_v3 }
  0x46   :  { %439 = vmatmul.mubr.msk.f32.gmra.mrb[4].mxu1 %vm23_vm0, %v76_v12 }
 0x109   :  { %v193_v30 = vpop.f32.mrb[0].mxu0 }
 0x10a   :  { %v662_v31 = vadd.f32 %v193_v30, %v106_v28  ;;  %v195_v32 = vpop.f32.mrb[1].mxu0 }
 0x10b   :  { %v196_v33 = vadd.f32 %v195_v32, %v110_v29 }
 0x10c   :  { %290 = vmax.xlane.f32.xlu0 %v662_v31 }
 0x10d   :  { %v329_v3 = vmin.f32 %v196_v33, 20.0  ;;  %v199_v34 = vpop.f32.mrb[2].mxu0  ;;  %vm365_vm3 = vcmp.gt.f32.partialorder %v196_v33, 20.0 }
 0x10e   :  { %v665_v35 = vadd.f32 %v199_v34, %v106_v28  ;;  %v201_v36 = vpop.f32.mrb[3].mxu0 }
 0x10f   :  { %v332_v37 = vmul.f32 1.442695, %v329_v3  ;;  %v202_v38 = vadd.f32 %v201_v36, %v110_v29 }
 0x110   :  { %292 = vmax.xlane.f32.xlu0 %v665_v35 }
 0x111   :  { %474 = vpow2.f32 %v332_v37  ;;  %v330_v39 = vmin.f32 %v202_v38, 20.0  ;;  %v205_v40 = vpop.f32.mrb[4].mxu0  ;;  %vm366_vm5 = vcmp.gt.f32.partialorder %v202_v38, 20.0  ;;  %v276_v19 = vpop.f32.mrb[0].mxu1 }
 0x112   :  { %v668_v41 = vadd.f32 %v205_v40, %v106_v28  ;;  %v207_v42 = vpop.f32.mrb[5].mxu0  ;;  %v277_v20 = vadd.f32 %v276_v19, %v114_v16  ;;  %v434_v21 = vpop.f32.mrb[1].mxu1 }
 0x113   :  { %v334_v43 = vmul.f32 1.442695, %v330_v39  ;;  %v208_v44 = vadd.f32 %v207_v42, %v110_v29 }
 0x114   :  { %294 = vmax.xlane.f32.xlu1 %v668_v41  ;;  %v374_v24 = vsub.f32 0.0, %v277_v20 }
 0x115   :  { %476 = vpow2.f32 %v334_v43  ;;  %v331_v45 = vmin.f32 %v208_v44, 20.0  ;;  %vm367_vm7 = vcmp.gt.f32.partialorder %v208_v44, 20.0  ;;  %v281_v27 = vpop.f32.mrb[2].mxu1 }
 0x116   :  { %v377_v28 = vmul.f32 1.442695, %v374_v24  ;;  %v282_v29 = vadd.f32 %v281_v27, %v114_v16  ;;  %v437_v30 = vpop.f32.mrb[3].mxu1 }
 0x117   :  { %v336_v46 = vmul.f32 1.442695, %v331_v45 }
 0x118   :  { %v375_v26 = vsub.f32 0.0, %v282_v29 }
 0x119   :  { %478 = vpow2.f32 %v336_v46 }
 0x11a   :  { %v379_v3 = vmul.f32 1.442695, %v375_v26 }
 0x11b   :  { %v475_v47 = vpop.eup %474 }
 0x11c   :  { %v338_v48 = vadd.f32 1.0, %v475_v47  ;;  %v341_v51 = vmul.f32 -0.5, %v475_v47  ;;  %v344_v56 = vand.u32 2147483647, %v475_v47 }
 0x11e   :  { %480 = vlog2.f32 %v338_v48  ;;  %v342_v54 = vadd.f32 1.0, %v341_v51  ;;  %vm345_vm2 = vcmp.lt.f32.partialorder %v344_v56, 0.0004427343 }
 0x11f   :  { %v477_v49 = vpop.eup %476 }
 0x120   :  { %v347_v50 = vadd.f32 1.0, %v477_v49  ;;  %v350_v55 = vmul.f32 -0.5, %v477_v49  ;;  %v343_v59 = vmul.f32 %v475_v47, %v342_v54  ;;  %v353_v63 = vand.u32 2147483647, %v477_v49 }
 0x122   :  { %482 = vlog2.f32 %v347_v50  ;;  %v351_v61 = vadd.f32 1.0, %v350_v55  ;;  %vm354_vm4 = vcmp.lt.f32.partialorder %v353_v63, 0.0004427343 }
 0x123   :  { %v479_v52 = vpop.eup %478 }
 0x124   :  { %v356_v53 = vadd.f32 1.0, %v479_v52  ;;  %v359_v62 = vmul.f32 -0.5, %v479_v52  ;;  %v352_v5 = vmul.f32 %v477_v49, %v351_v61  ;;  %v362_v7 = vand.u32 2147483647, %v479_v52 }
 0x126   :  { %484 = vlog2.f32 %v356_v53  ;;  %v360_v6 = vadd.f32 1.0, %v359_v62  ;;  %vm363_vm6 = vcmp.lt.f32.partialorder %v362_v7, 0.0004427343 }
 0x128   :  { %v481_v57 = vpop.eup %480  ;;  %v361_v12 = vmul.f32 %v479_v52, %v360_v6 }
 0x129   :  { %v340_v58 = vmul.f32 0.6931472, %v481_v57 }
 0x12b   :  { %v346_v0 = vsel %vm345_vm2, %v343_v59, %v340_v58 }
 0x12c   :  { %v483_v1 = vpop.eup %482  ;;  %v368_v2 = vsel %vm365_vm3, %v196_v33, %v346_v0  ;;  %v286_v33 = vpop.f32.mrb[4].mxu1 }
 0x12d   :  { %371 = vst [vmem:[%s708_s5 + $0x8] sm:$0xff] %v368_v2  ;;  %v349_v4 = vmul.f32 0.6931472, %v483_v1  ;;  %v287_v34 = vadd.f32 %v286_v33, %v114_v16  ;;  %v440_v36 = vpop.f32.mrb[5].mxu1 }
 0x12f   :  { %v355_v8 = vsel %vm354_vm4, %v352_v5, %v349_v4 }
 0x130   :  { %v485_v9 = vpop.eup %484  ;;  %v369_v10 = vsel %vm366_vm5, %v202_v38, %v355_v8  ;;  %v376_v38 = vsub.f32 0.0, %v287_v34 }
 0x131   :  { %372 = vst [vmem:[%s708_s5 + $0x20] sm:$0xff] %v369_v10  ;;  %v358_v11 = vmul.f32 0.6931472, %v485_v9 }
 0x133   :  { %v364_v13 = vsel %vm363_vm6, %v361_v12, %v358_v11 }
 0x134   :  { %v370_v14 = vsel %vm367_vm7, %v208_v44, %v364_v13 }
 0x135   :  { %373 = vst [vmem:[%s708_s5 + $0x38] sm:$0xff] %v370_v14 }
 0x199   :  { %v291_v17 = vpop.xlane.xlu0 %290 }
 0x19a   :  { %v296_v18 = vsub.f32 %v662_v31, %v291_v17 }
 0x19c   :  { %v299_v22 = vmul.f32 1.442695, %v296_v18 }
 0x19d   :  { %v293_v23 = vpop.xlane.xlu0 %292 }
 0x19e   :  { %486 = vpow2.f32 %v299_v22  ;;  %v297_v25 = vsub.f32 %v665_v35, %v293_v23  ;;  %v381_v35 = vmul.f32 1.442695, %v376_v38 }
 0x19f   :  { %488 = vpow2.f32 %v377_v28 }
 0x1a0   :  { %v301_v32 = vmul.f32 1.442695, %v297_v25 }
 0x1a1   :  { %v295_v60 = vpop.xlane.xlu1 %294 }
 0x1a2   :  { %490 = vpow2.f32 %v301_v32  ;;  %v298_v31 = vsub.f32 %v668_v41, %v295_v60 }
 0x1a3   :  { %492 = vpow2.f32 %v379_v3 }
 0x1a4   :  { %v303_v37 = vmul.f32 1.442695, %v298_v31 }
 0x1a6   :  { %494 = vpow2.f32 %v303_v37 }
 0x1a7   :  { %496 = vpow2.f32 %v381_v35 }
 0x1a8   :  { %v487_v39 = vpop.eup %486 }
 0x1a9   :  { %305 = vadd.xlane.f32.xlu1 %v487_v39  ;;  %v489_v40 = vpop.eup %488 }
 0x1aa   :  { %v383_v43 = vadd.f32 1.0, %v489_v40 }
 0x1ac   :  { %v491_v42 = vpop.eup %490  ;;  %498 = vrcp.f32 %v383_v43 }
 0x1ad   :  { %307 = vadd.xlane.f32.xlu0 %v491_v42  ;;  %v493_v44 = vpop.eup %492 }
 0x1ae   :  { %v384_v41 = vadd.f32 1.0, %v493_v44 }
 0x1b0   :  { %v495_v45 = vpop.eup %494  ;;  %500 = vrcp.f32 %v384_v41 }
 0x1b1   :  { %309 = vadd.xlane.f32.xlu1 %v495_v45  ;;  %v497_v46 = vpop.eup %496 }
 0x1b2   :  { %v385_v47 = vadd.f32 1.0, %v497_v46 }
 0x1b4   :  { %502 = vrcp.f32 %v385_v47 }
 0x1b6   :  { %v499_v48 = vpop.eup %498 }
 0x1b7   :  { %392 = vst [vmem:[%s708_s5 + $0x10] sm:$0xff] %v499_v48 }
 0x1ba   :  { %v501_v49 = vpop.eup %500 }
 0x1bb   :  { %393 = vst [vmem:[%s708_s5 + $0x28] sm:$0xff] %v501_v49 }
 0x1be   :  { %v503_v50 = vpop.eup %502 }
 0x1bf   :  { %394 = vst [vmem:[%s708_s5 + $0x40] sm:$0xff] %v503_v50 }
 0x236   :  { %v306_v51 = vpop.xlane.xlu1 %305 }
 0x237   :  { %504 = vrcp.f32 %v306_v51 }
 0x23a   :  { %v308_v52 = vpop.xlane.xlu0 %307 }
 0x23b   :  { %506 = vrcp.f32 %v308_v52 }
 0x23e   :  { %v310_v53 = vpop.xlane.xlu1 %309 }
 0x23f   :  { %508 = vrcp.f32 %v310_v53 }
 0x241   :  { %v505_v54 = vpop.eup %504 }
 0x242   :  { %v314_v55 = vmul.f32 %v505_v54, %v306_v51 }
 0x244   :  { %v317_v56 = vsub.f32 2.0, %v314_v55 }
 0x245   :  { %v507_v57 = vpop.eup %506 }
 0x246   :  { %v320_v58 = vmul.f32 %v505_v54, %v317_v56  ;;  %v315_v59 = vmul.f32 %v507_v57, %v308_v52 }
 0x248   :  { %v323_v61 = vmul.f32 %v487_v39, %v320_v58  ;;  %v318_v62 = vsub.f32 2.0, %v315_v59 }
 0x249   :  { %v509_v63 = vpop.eup %508 }
 0x24a   :  { %326 = vst [vmem:[%s708_s5] sm:$0xff] %v323_v61  ;;  %v321_v0 = vmul.f32 %v507_v57, %v318_v62  ;;  %v316_v1 = vmul.f32 %v509_v63, %v310_v53 }
 0x24c   :  { %v324_v2 = vmul.f32 %v491_v42, %v321_v0  ;;  %v319_v4 = vsub.f32 2.0, %v316_v1 }
 0x24e   :  { %327 = vst [vmem:[%s708_s5 + $0x18] sm:$0xff] %v324_v2  ;;  %v322_v5 = vmul.f32 %v509_v63, %v319_v4 }
 0x250   :  { %v325_v6 = vmul.f32 %v495_v45, %v322_v5 }
 0x252   :  { %328 = vst [vmem:[%s708_s5 + $0x30] sm:$0xff] %v325_v6 }

</bundles_post_ra>
